<compile_context>
chip_gen: v7x
topology: tpu7x:2x2x1
jax: 0.10.0
libtpu: 0.0.40
codegen_flags: <defaults>
</compile_context>

<pallas_src>
import functools
import math

import jax
import jax.numpy as jnp
from jax.experimental import pallas as pl
from jax.experimental.pallas import tpu as pltpu


PARAMETER = {
    "encoder_nums": 2,
    "segmentation": [0, 8, 16],                     # feature slicing of x along dim 2
    "encoder_dims": [[8, 32, 16], [8, 32, 16]],     # per-encoder MLP dims
    "encoder_activations": ["relu", "tanh"],        # per-encoder activation
    "encoder_dropout": 0.1,                         # inference mode: identity
}

# Tiling over the batch-row axis (each batch row covers S sequence positions).
_MAX_TILE_ROWS = 4096        # 4096 B-rows * (256 B in + 1024 B out) * 2 bufs ~= 10.5 MiB
_MIN_TILE_ROWS = 512         # below this per-step overhead dominates; don't split further
_PREFERRED_STEPS = 4         # aim for >=4 grid steps when B is large (v7x megacore)
_VMEM_LIMIT_BYTES = 28 * 1024 * 1024   # safe on v7x (64 MiB phys) and v5e/v6e (128 MiB)


# ----------------------------------------------------------------------------
# Activation helpers (pure jnp -> usable both inside the kernel and in the ref)
# ----------------------------------------------------------------------------
def _apply_act(y, name):
    if name == "relu":
        return jnp.maximum(y, 0.0)
    if name == "tanh":
        return jnp.tanh(y)
    if name == "gelu":
        return jax.nn.gelu(y, approximate=False)    # exact erf, matches nn.GELU default
    return y                                        # "linear" / identity


def _blockwise_act(y, block_n, boundaries, acts):
    """Per-encoder activation on y whose columns repeat the per-sequence block
    [enc0 | enc1 | ...] every `block_n` columns (Kron-packed layout)."""
    if len(set(acts)) == 1:
        return _apply_act(y, acts[0])
    col = jax.lax.broadcasted_iota(jnp.int32, y.shape, y.ndim - 1)
    pos = col % block_n                              # position within the repeated block
    out = y
    for (lo, hi), act in zip(zip(boundaries[:-1], boundaries[1:]), acts):
        out = jnp.where((pos >= lo) & (pos < hi), _apply_act(y, act), out)
    return out


# ----------------------------------------------------------------------------
# Fused Pallas kernel: all packed layers + positional add (no in-kernel reshapes)
# ----------------------------------------------------------------------------
def _fused_embedding_kernel(*refs, n_layers, block_ns, boundaries, acts, compute_dtype):
    """refs = (x, w_0, b_0, ..., w_{L-1}, b_{L-1}, pe, out)

    x  : (T, S*F)   bf16   (lane dense, S*F = 128)
    w_l: (S*K_l, S*N_l) bf16 (Kron-packed, constant block)
    b_l: (1, S*N_l) f32
    pe : (1, S*D)   f32
    out: (T, S*D)   f32/bf16 (lane dense, S*D = 256)
    """
    x_ref = refs[0]
    pe_ref = refs[1 + 2 * n_layers]
    o_ref = refs[2 + 2 * n_layers]

    h = x_ref[...]                                   # (T, S*F) bf16
    for l in range(n_layers):
        w = refs[1 + 2 * l][...]
        b = refs[2 + 2 * l][...]
        y = jnp.dot(h.astype(compute_dtype), w,
                    preferred_element_type=jnp.float32) + b   # f32 accumulate + bias
        h = _blockwise_act(y, block_ns[l], boundaries[l], acts)
    o_ref[...] = (h + pe_ref[...]).astype(o_ref.dtype)        # positional add, f32 math


# ----------------------------------------------------------------------------
# Parameter setup (deterministic, synthetic -- mirrors the module __init__)
# ----------------------------------------------------------------------------
def init_encoder_params(key, dims):
    """PyTorch-nn.Linear-style uniform init, deterministic via key."""
    layers = []
    for i in range(len(dims) - 1):
        fan_in, fan_out = dims[i], dims[i + 1]
        key, kw, kb = jax.random.split(key, 3)
        bound = 1.0 / math.sqrt(fan_in)
        w = jax.random.uniform(kw, (fan_in, fan_out), jnp.float32, -bound, bound)
        b = jax.random.uniform(kb, (1, fan_out), jnp.float32, -bound, bound)
        layers.append((w, b))
    return layers


def sinusoidal_positional_embedding(seq_len, d_model):
    """Standard PositionalEmbedding table, shape (seq_len, d_model)."""
    pos = jnp.arange(seq_len, dtype=jnp.float32)[:, None]
    div = jnp.exp(
        jnp.arange(0, d_model, 2, dtype=jnp.float32) * -(math.log(10000.0) / d_model))
    pe = jnp.zeros((seq_len, d_model), jnp.float32)
    pe = pe.at[:, 0::2].set(jnp.sin(pos * div))
    pe = pe.at[:, 1::2].set(jnp.cos(pos * div))
    return pe


def pack_block_diagonal(encoder_params, parameter):
    """Merge the per-encoder MLP stacks into block-diagonal weights so the whole
    Embedding is a single matmul chain and the output lands pre-concatenated
    in [enc0 | enc1 | ...] order (segmentation slices are contiguous)."""
    n_enc = parameter["encoder_nums"]
    dims = parameter["encoder_dims"]
    n_layers = len(dims[0]) - 1
    # TODO(synk): block-diagonal packing assumes all encoders have the same depth
    # (true for this config); unequal depths would need a per-encoder fallback.
    assert all(len(d) - 1 == n_layers for d in dims)

    packed, boundaries = [], []
    for l in range(n_layers):
        ws = [encoder_params[i][l][0] for i in range(n_enc)]
        bs = [encoder_params[i][l][1] for i in range(n_enc)]
        in_dims = [w.shape[0] for w in ws]
        out_dims = [w.shape[1] for w in ws]
        W = jnp.zeros((sum(in_dims), sum(out_dims)), jnp.float32)
        r = c = 0
        for w in ws:
            W = W.at[r:r + w.shape[0], c:c + w.shape[1]].set(w)
            r += w.shape[0]
            c += w.shape[1]
        packed.append((W, jnp.concatenate(bs, axis=1)))
        bnd = [0]
        for o in out_dims:
            bnd.append(bnd[-1] + o)
        boundaries.append(tuple(bnd))
    return packed, boundaries


def kron_pack(packed, seq_len, compute_dtype):
    """Kron-expand the per-layer block-diagonal weights by I_S so the kernel runs on
    lane-dense (B, S*F) slabs; column s*N+n of layer l corresponds to sequence position
    s, concatenated-encoder feature n (exactly the torch.cat(dim=2) layout)."""
    eye = jnp.eye(seq_len, dtype=jnp.float32)
    layers, block_ns = [], []
    for (W, b) in packed:
        Wk = jnp.kron(eye, W).astype(compute_dtype)          # (S*K, S*N) bf16
        bk = jnp.tile(b, (1, seq_len))                       # (1, S*N)  f32
        layers.append((Wk, bk))
        block_ns.append(W.shape[1])
    return layers, tuple(block_ns)


def build_embedding(parameter, encoder_params, seq_len, compute_dtype=jnp.bfloat16):
    """Pre-pack weights (bf16, Kron-expanded) and build the positional table ONCE."""
    seg = parameter["segmentation"]
    assert all(a < b for a, b in zip(seg[:-1], seg[1:])), \
        "segmentation must be contiguous & increasing for single-slice packing"
    packed, boundaries = pack_block_diagonal(encoder_params, parameter)
    layers, block_ns = kron_pack(packed, seq_len, compute_dtype)
    d_model = sum(d[-1] for d in parameter["encoder_dims"])
    pe = sinusoidal_positional_embedding(seq_len, d_model).reshape(1, seq_len * d_model)
    return {
        "layers": layers,
        "block_ns": block_ns,
        "boundaries": tuple(boundaries),
        "acts": tuple(parameter["encoder_activations"]),
        "pe": pe,
        "seq_len": seq_len,
        "d_model": d_model,
        "seg": (seg[0], seg[-1]),
        "compute_dtype": compute_dtype,
    }


# ----------------------------------------------------------------------------
# Forward pass: one fused pallas_call
# ----------------------------------------------------------------------------
def _pick_tile_rows(n_rows):
    """Large, sublane-aligned batch-row tiles; >=_PREFERRED_STEPS grid steps when
    there is enough work (v7x megacore), capped by a v7x-safe VMEM budget."""
    if n_rows <= _MIN_TILE_ROWS:
        return n_rows                                     # single step, block == full dim
    target = (n_rows + _PREFERRED_STEPS - 1) // _PREFERRED_STEPS
    tile = min(_MAX_TILE_ROWS, max(_MIN_TILE_ROWS, target))
    return ((tile + 7) // 8) * 8                          # sublane-aligned, < n_rows


def embedding_forward(x, emb, out_dtype=None):
    """x: (B, S, F_total). Returns (B, S, embedding_dim).

    out_dtype defaults to x.dtype (f32, matching the torch module); pass jnp.bfloat16
    to halve the output HBM traffic if downstream tolerates it."""
    # TODO(synk): dropout omitted (eval-mode identity); .cuda() move is N/A in JAX.
    seg_lo, seg_hi = emb["seg"]
    layers = emb["layers"]
    block_ns = emb["block_ns"]
    boundaries = emb["boundaries"]
    acts = emb["acts"]
    pe = emb["pe"]
    compute_dtype = emb["compute_dtype"]
    S = emb["seq_len"]
    D = emb["d_model"]

    B, S_in, _ = x.shape
    assert S_in == S, "seq_len must match the prebuilt positional table"
    F = seg_hi - seg_lo
    out_dtype = out_dtype or x.dtype

    # Contiguous, ordered segmentation -> one slice; flatten to a lane-dense (B, S*F)
    # slab (free XLA reshape on HBM) so the kernel body needs no reshapes at all.
    x_in = x[:, :, seg_lo:seg_hi].reshape(B, S * F).astype(compute_dtype)

    tile = _pick_tile_rows(B)
    grid = (pl.cdiv(B, tile),)

    n_layers = len(layers)
    kernel = functools.partial(
        _fused_embedding_kernel,
        n_layers=n_layers,
        block_ns=block_ns,
        boundaries=boundaries,
        acts=acts,
        compute_dtype=compute_dtype,
    )

    in_specs = [pl.BlockSpec((tile, S * F), lambda i: (i, 0))]
    operands = [x_in]
    for (w, b) in layers:
        in_specs.append(pl.BlockSpec(w.shape, lambda i: (0, 0)))     # constant block
        in_specs.append(pl.BlockSpec(b.shape, lambda i: (0, 0)))
        operands.extend((w, b))
    in_specs.append(pl.BlockSpec(pe.shape, lambda i: (0, 0)))        # constant block
    operands.append(pe)
    out_specs = pl.BlockSpec((tile, S * D), lambda i: (i, 0))        # 256-lane dense

    # Advisory cost estimate so XLA schedules the custom call sensibly.
    flops = sum(2 * B * w.shape[0] * w.shape[1] for w, _ in layers) + B * S * D
    transc = 0
    for l in range(n_layers):
        bnd = boundaries[l]
        per_block = sum((hi - lo)
                        for (lo, hi), a in zip(zip(bnd[:-1], bnd[1:]), acts)
                        if a in ("tanh", "gelu"))
        transc += B * S * per_block
    bytes_accessed = (
        x_in.size * x_in.dtype.itemsize
        + sum(w.size * w.dtype.itemsize + b.size * b.dtype.itemsize for w, b in layers)
        + pe.size * pe.dtype.itemsize
        + B * S * D * jnp.dtype(out_dtype).itemsize
    )

    y_flat = pl.pallas_call(
        kernel,
        out_shape=jax.ShapeDtypeStruct((B, S * D), out_dtype),
        grid=grid,
        in_specs=in_specs,
        out_specs=out_specs,
        compiler_params=pltpu.CompilerParams(
            dimension_semantics=("parallel",),        # megacore / v7x second TC
            vmem_limit_bytes=_VMEM_LIMIT_BYTES,       # v7x-safe (64 MiB physical)
        ),
        cost_estimate=pl.CostEstimate(
            flops=int(flops),
            transcendentals=int(transc),
            bytes_accessed=int(bytes_accessed),
        ),
    )(*operands)
    return y_flat.reshape(B, S, D)                    # free XLA reshape on HBM


# ----------------------------------------------------------------------------
# Pure-JAX reference (mirrors the PyTorch module, same bf16 casts as the kernel)
# ----------------------------------------------------------------------------
def embedding_reference(x, parameter, encoder_params, compute_dtype=jnp.bfloat16):
    B, S, _ = x.shape
    seg = parameter["segmentation"]
    acts = parameter["encoder_activations"]
    ys = []
    for i in range(parameter["encoder_nums"]):
        h = x[:, :, seg[i]:seg[i + 1]].reshape(B * S, -1)
        for (w, b) in encoder_params[i]:
            y = jnp.dot(h.astype(compute_dtype), w.astype(compute_dtype),
                        preferred_element_type=jnp.float32) + b
            h = _apply_act(y, acts[i])
        ys.append(h.reshape(B, S, -1))
    y = jnp.concatenate(ys, axis=2)
    pe = sinusoidal_positional_embedding(S, y.shape[-1])[None]
    return y + pe


if __name__ == "__main__":
    key = jax.random.PRNGKey(0)
    key, kx, kp = jax.random.split(key, 3)

    B, S = 2, 8
    F = PARAMETER["segmentation"][-1]                       # 16 total features
    x = jax.random.normal(kx, (B, S, F), jnp.float32)

    enc_keys = jax.random.split(kp, PARAMETER["encoder_nums"])
    encoder_params = [
        init_encoder_params(enc_keys[i], PARAMETER["encoder_dims"][i])
        for i in range(PARAMETER["encoder_nums"])
    ]

    emb = build_embedding(PARAMETER, encoder_params, seq_len=S)

    @jax.jit
    def fwd(x_):
        return embedding_forward(x_, emb)

    y = fwd(x)
    jax.block_until_ready(y)

    embedding_dim = sum(d[-1] for d in PARAMETER["encoder_dims"])
    assert y.shape == (B, S, embedding_dim), y.shape

    y_ref = embedding_reference(x, PARAMETER, encoder_params,
                                compute_dtype=emb["compute_dtype"])
    assert jnp.allclose(y, y_ref, atol=1e-3, rtol=1e-3), float(
        jnp.max(jnp.abs(y - y_ref)))

    print("KERNEL_OK")
</pallas_src>

<mosaic_0001>
module attributes {stable_mosaic.version = 11 : i64} {
  func.func @_fused_embedding_kernel(%arg0: i32, %arg1: memref<2x128xbf16, #tpu.memory_space<vmem>>, %arg2: memref<128x512xbf16, #tpu.memory_space<vmem>>, %arg3: memref<1x512xf32, #tpu.memory_space<vmem>>, %arg4: memref<512x256xbf16, #tpu.memory_space<vmem>>, %arg5: memref<1x256xf32, #tpu.memory_space<vmem>>, %arg6: memref<1x256xf32, #tpu.memory_space<vmem>>, %arg7: memref<2x256xf32, #tpu.memory_space<vmem>>) attributes {dimension_semantics = [#tpu.dimension_semantics<parallel>], iteration_bounds = array<i64: 1>, scalar_prefetch = 0 : i64, scratch_operands = 0 : i64, tpu.core_type = #tpu.core_type<tc>, window_params = [{transform_indices = @transform_0, window_bounds = array<i64: 2, 128>}, {pipeline_mode = #tpu.pipeline_mode<synchronous>, transform_indices = @transform_1, window_bounds = array<i64: 128, 512>}, {pipeline_mode = #tpu.pipeline_mode<synchronous>, transform_indices = @transform_2, window_bounds = array<i64: 1, 512>}, {pipeline_mode = #tpu.pipeline_mode<synchronous>, transform_indices = @transform_3, window_bounds = array<i64: 512, 256>}, {pipeline_mode = #tpu.pipeline_mode<synchronous>, transform_indices = @transform_4, window_bounds = array<i64: 1, 256>}, {pipeline_mode = #tpu.pipeline_mode<synchronous>, transform_indices = @transform_5, window_bounds = array<i64: 1, 256>}, {transform_indices = @transform_6, window_bounds = array<i64: 2, 256>}]} {
    %c0 = arith.constant 0 : index
    %c0_0 = arith.constant 0 : index
    %0 = vector.load %arg1[%c0, %c0_0] : memref<2x128xbf16, #tpu.memory_space<vmem>>, vector<2x128xbf16>
    %c0_1 = arith.constant 0 : index
    %c0_2 = arith.constant 0 : index
    %1 = vector.load %arg2[%c0_1, %c0_2] : memref<128x512xbf16, #tpu.memory_space<vmem>>, vector<128x512xbf16>
    %c0_3 = arith.constant 0 : index
    %c0_4 = arith.constant 0 : index
    %2 = vector.load %arg3[%c0_3, %c0_4] : memref<1x512xf32, #tpu.memory_space<vmem>>, vector<1x512xf32>
    %cst = arith.constant dense<0.000000e+00> : vector<2x512xf32>
    %3 = tpu.matmul %0, %1, %cst {dimension_numbers = #tpu.dot_dimension_numbers<[1], [0], [0], [1], [0, 0, 1, 1], [], []>} : vector<2x128xbf16>, vector<128x512xbf16>, vector<2x512xf32> -> vector<2x512xf32>
    %4 = vector.broadcast %2 : vector<1x512xf32> to vector<2x512xf32>
    %5 = arith.addf %3, %4 : vector<2x512xf32>
    %6 = tpu.iota {dimensions = array<i32: 1>} : vector<2x512xi32>
    %c64_i32 = arith.constant 64 : i32
    %c0_i32 = arith.constant 0 : i32
    %7 = arith.cmpi eq, %c64_i32, %c0_i32 : i32
    %c1_i32 = arith.constant 1 : i32
    %8 = arith.select %7, %c1_i32, %c64_i32 : i32
    %9 = vector.broadcast %8 : i32 to vector<2x512xi32>
    %10 = arith.remsi %6, %9 : vector<2x512xi32>
    %c0_i32_5 = arith.constant 0 : i32
    %11 = vector.broadcast %c0_i32_5 : i32 to vector<2x512xi32>
    %12 = arith.cmpi ne, %10, %11 : vector<2x512xi32>
    %c0_i32_6 = arith.constant 0 : i32
    %13 = vector.broadcast %c0_i32_6 : i32 to vector<2x512xi32>
    %14 = arith.cmpi slt, %10, %13 : vector<2x512xi32>
    %c0_i32_7 = arith.constant 0 : i32
    %15 = arith.cmpi slt, %8, %c0_i32_7 : i32
    %16 = vector.broadcast %15 : i1 to vector<2x512xi1>
    %17 = vector.broadcast %16 : vector<2x512xi1> to vector<2x512xi1>
    %18 = arith.xori %14, %17 : vector<2x512xi1>
    %19 = arith.andi %18, %12 : vector<2x512xi1>
    %20 = vector.broadcast %8 : i32 to vector<2x512xi32>
    %21 = arith.addi %10, %20 : vector<2x512xi32>
    %22 = arith.select %19, %21, %10 : vector<2x512xi1>, vector<2x512xi32>
    %c0_i32_8 = arith.constant 0 : i32
    %23 = vector.broadcast %c0_i32_8 : i32 to vector<2x512xi32>
    %24 = arith.cmpi sge, %22, %23 : vector<2x512xi32>
    %c32_i32 = arith.constant 32 : i32
    %25 = vector.broadcast %c32_i32 : i32 to vector<2x512xi32>
    %26 = arith.cmpi slt, %22, %25 : vector<2x512xi32>
    %27 = arith.andi %24, %26 : vector<2x512xi1>
    %cst_9 = arith.constant 0.000000e+00 : f32
    %28 = vector.broadcast %cst_9 : f32 to vector<2x512xf32>
    %29 = arith.maximumf %5, %28 : vector<2x512xf32>
    %30 = arith.select %27, %29, %5 : vector<2x512xi1>, vector<2x512xf32>
    %c32_i32_10 = arith.constant 32 : i32
    %31 = vector.broadcast %c32_i32_10 : i32 to vector<2x512xi32>
    %32 = arith.cmpi sge, %22, %31 : vector<2x512xi32>
    %c64_i32_11 = arith.constant 64 : i32
    %33 = vector.broadcast %c64_i32_11 : i32 to vector<2x512xi32>
    %34 = arith.cmpi slt, %22, %33 : vector<2x512xi32>
    %35 = arith.andi %32, %34 : vector<2x512xi1>
    %36 = math.tanh %5 : vector<2x512xf32>
    %37 = arith.select %35, %36, %30 : vector<2x512xi1>, vector<2x512xf32>
    %c0_12 = arith.constant 0 : index
    %c0_13 = arith.constant 0 : index
    %38 = vector.load %arg4[%c0_12, %c0_13] : memref<512x256xbf16, #tpu.memory_space<vmem>>, vector<512x256xbf16>
    %c0_14 = arith.constant 0 : index
    %c0_15 = arith.constant 0 : index
    %39 = vector.load %arg5[%c0_14, %c0_15] : memref<1x256xf32, #tpu.memory_space<vmem>>, vector<1x256xf32>
    %40 = arith.truncf %37 : vector<2x512xf32> to vector<2x512xbf16>
    %cst_16 = arith.constant dense<0.000000e+00> : vector<2x256xf32>
    %41 = tpu.matmul %40, %38, %cst_16 {dimension_numbers = #tpu.dot_dimension_numbers<[1], [0], [0], [1], [0, 0, 1, 1], [], []>} : vector<2x512xbf16>, vector<512x256xbf16>, vector<2x256xf32> -> vector<2x256xf32>
    %42 = vector.broadcast %39 : vector<1x256xf32> to vector<2x256xf32>
    %43 = arith.addf %41, %42 : vector<2x256xf32>
    %44 = tpu.iota {dimensions = array<i32: 1>} : vector<2x256xi32>
    %c32_i32_17 = arith.constant 32 : i32
    %c0_i32_18 = arith.constant 0 : i32
    %45 = arith.cmpi eq, %c32_i32_17, %c0_i32_18 : i32
    %c1_i32_19 = arith.constant 1 : i32
    %46 = arith.select %45, %c1_i32_19, %c32_i32_17 : i32
    %47 = vector.broadcast %46 : i32 to vector<2x256xi32>
    %48 = arith.remsi %44, %47 : vector<2x256xi32>
    %c0_i32_20 = arith.constant 0 : i32
    %49 = vector.broadcast %c0_i32_20 : i32 to vector<2x256xi32>
    %50 = arith.cmpi ne, %48, %49 : vector<2x256xi32>
    %c0_i32_21 = arith.constant 0 : i32
    %51 = vector.broadcast %c0_i32_21 : i32 to vector<2x256xi32>
    %52 = arith.cmpi slt, %48, %51 : vector<2x256xi32>
    %c0_i32_22 = arith.constant 0 : i32
    %53 = arith.cmpi slt, %46, %c0_i32_22 : i32
    %54 = vector.broadcast %53 : i1 to vector<2x256xi1>
    %55 = vector.broadcast %54 : vector<2x256xi1> to vector<2x256xi1>
    %56 = arith.xori %52, %55 : vector<2x256xi1>
    %57 = arith.andi %56, %50 : vector<2x256xi1>
    %58 = vector.broadcast %46 : i32 to vector<2x256xi32>
    %59 = arith.addi %48, %58 : vector<2x256xi32>
    %60 = arith.select %57, %59, %48 : vector<2x256xi1>, vector<2x256xi32>
    %c0_i32_23 = arith.constant 0 : i32
    %61 = vector.broadcast %c0_i32_23 : i32 to vector<2x256xi32>
    %62 = arith.cmpi sge, %60, %61 : vector<2x256xi32>
    %c16_i32 = arith.constant 16 : i32
    %63 = vector.broadcast %c16_i32 : i32 to vector<2x256xi32>
    %64 = arith.cmpi slt, %60, %63 : vector<2x256xi32>
    %65 = arith.andi %62, %64 : vector<2x256xi1>
    %cst_24 = arith.constant 0.000000e+00 : f32
    %66 = vector.broadcast %cst_24 : f32 to vector<2x256xf32>
    %67 = arith.maximumf %43, %66 : vector<2x256xf32>
    %68 = arith.select %65, %67, %43 : vector<2x256xi1>, vector<2x256xf32>
    %c16_i32_25 = arith.constant 16 : i32
    %69 = vector.broadcast %c16_i32_25 : i32 to vector<2x256xi32>
    %70 = arith.cmpi sge, %60, %69 : vector<2x256xi32>
    %c32_i32_26 = arith.constant 32 : i32
    %71 = vector.broadcast %c32_i32_26 : i32 to vector<2x256xi32>
    %72 = arith.cmpi slt, %60, %71 : vector<2x256xi32>
    %73 = arith.andi %70, %72 : vector<2x256xi1>
    %74 = math.tanh %43 : vector<2x256xf32>
    %75 = arith.select %73, %74, %68 : vector<2x256xi1>, vector<2x256xf32>
    %c0_27 = arith.constant 0 : index
    %c0_28 = arith.constant 0 : index
    %76 = vector.load %arg6[%c0_27, %c0_28] : memref<1x256xf32, #tpu.memory_space<vmem>>, vector<1x256xf32>
    %77 = vector.broadcast %76 : vector<1x256xf32> to vector<2x256xf32>
    %78 = arith.addf %75, %77 : vector<2x256xf32>
    %c0_29 = arith.constant 0 : index
    %c0_30 = arith.constant 0 : index
    %79 = vector.load %arg7[%c0_29, %c0_30] : memref<2x256xf32, #tpu.memory_space<vmem>>, vector<2x256xf32>
    tpu.vector_store %arg7[%c0_29, %c0_30], %78 {strides = array<i32>} : memref<2x256xf32, #tpu.memory_space<vmem>>, vector<2x256xf32>,
    return
  }
  func.func @transform_0(%arg0: i32) -> (i32, i32) {
    %c0_i32 = arith.constant 0 : i32
    %c0_i32_0 = arith.constant 0 : i32
    return %arg0, %c0_i32 : i32, i32
  }
  func.func @transform_1(%arg0: i32) -> (i32, i32) {
    %c0_i32 = arith.constant 0 : i32
    %c0_i32_0 = arith.constant 0 : i32
    %c0_i32_1 = arith.constant 0 : i32
    return %c0_i32, %c0_i32_0 : i32, i32
  }
  func.func @transform_2(%arg0: i32) -> (i32, i32) {
    %c0_i32 = arith.constant 0 : i32
    %c0_i32_0 = arith.constant 0 : i32
    %c0_i32_1 = arith.constant 0 : i32
    return %c0_i32, %c0_i32_0 : i32, i32
  }
  func.func @transform_3(%arg0: i32) -> (i32, i32) {
    %c0_i32 = arith.constant 0 : i32
    %c0_i32_0 = arith.constant 0 : i32
    %c0_i32_1 = arith.constant 0 : i32
    return %c0_i32, %c0_i32_0 : i32, i32
  }
  func.func @transform_4(%arg0: i32) -> (i32, i32) {
    %c0_i32 = arith.constant 0 : i32
    %c0_i32_0 = arith.constant 0 : i32
    %c0_i32_1 = arith.constant 0 : i32
    return %c0_i32, %c0_i32_0 : i32, i32
  }
  func.func @transform_5(%arg0: i32) -> (i32, i32) {
    %c0_i32 = arith.constant 0 : i32
    %c0_i32_0 = arith.constant 0 : i32
    %c0_i32_1 = arith.constant 0 : i32
    return %c0_i32, %c0_i32_0 : i32, i32
  }
  func.func @transform_6(%arg0: i32) -> (i32, i32) {
    %c0_i32 = arith.constant 0 : i32
    %c0_i32_0 = arith.constant 0 : i32
    return %arg0, %c0_i32 : i32, i32
  }
}

</mosaic_0001>

<bundles_post_ra>
// kernel: fwd.1
= control target key start
LH: loop header
LB: loop body
LE: loop exit
PB: predicated region body
PF: predicated region fallthrough
CT: control target
= control target key end

     0   :  { %v1228_v1 = vmov 0   ;;  %s1588_s1 = inlined_call_operand.vmem [shape: bf16[128,512], index: 1, kind: input, shape index: {}]   ;;  %s1589_s3 = inlined_call_operand.vmem [shape: bf16[512,256], index: 3, kind: input, shape index: {}]   ;;  %s1590_s0 = inlined_call_operand.vmem [shape: bf16[2,128], index: 0, kind: input, shape index: {}]   ;;  %s1591_s2 = inlined_call_operand.vmem [shape: f32[1,512], index: 2, kind: input, shape index: {}]   ;;  %s1592_s4 = inlined_call_operand.vmem [shape: f32[1,256], index: 4, kind: input, shape index: {}]   ;;  %s1593_s5 = inlined_call_operand.vmem [shape: f32[1,256], index: 5, kind: input, shape index: {}]   ;;  %s1594_s6 = inlined_call_operand.vmem [shape: f32[2,256], index: 6, kind: output, shape index: {}]  }
   0x1   :  { %v1072_v0 = vld [vmem:[%s1588_s1 + $0x4] ss:$16 sps:$4 sm:$0xff]   ;;  %271 = vmatprep.mubr.bf16.mxu0 %v1228_v1  ;;  %312 = vmatprep.mubr.bf16.mxu1 %v1228_v1  ;;  %v1074_v2 = vld [vmem:[%s1588_s1 + $0xc] ss:$16 sps:$4 sm:$0xff]   ;;  %v1076_v3 = vld [vmem:[%s1588_s1] ss:$16 sps:$4 sm:$0xff]  }
   0x2   :  { %239 = vmatprep.subr.bf16.mxu0 %v1072_v0  ;;  %v1077_v4 = vld [vmem:[%s1588_s1 + $0x8] ss:$16 sps:$4 sm:$0xff]   ;;  %280 = vmatprep.subr.bf16.mxu1 %v1074_v2  ;;  %v1078_v5 = vld [vmem:[%s1588_s1 + $0x24] ss:$16 sps:$4 sm:$0xff]   ;;  %v1080_v6 = vld [vmem:[%s1588_s1 + $0x2c] ss:$16 sps:$4 sm:$0xff]  }
   0x3   :  { %240 = vmatpush1.bf16.msra.mxu0 %v1076_v3  ;;  %281 = vmatpush1.bf16.msra.mxu1 %v1077_v4  ;;  %v1082_v7 = vld [vmem:[%s1588_s1 + $0x20] ss:$16 sps:$4 sm:$0xff]   ;;  %v1083_v8 = vld [vmem:[%s1588_s1 + $0x28] ss:$16 sps:$4 sm:$0xff]   ;;  %v1084_v9 = vld [vmem:[%s1588_s1 + $0x44] ss:$16 sps:$4 sm:$0xff]  }
   0x4   :  { %241 = vmatprep.subr.bf16.mxu0 %v1078_v5  ;;  %282 = vmatprep.subr.bf16.mxu1 %v1080_v6  ;;  %v1086_v10 = vld [vmem:[%s1588_s1 + $0x4c] ss:$16 sps:$4 sm:$0xff]   ;;  %v1088_v11 = vld [vmem:[%s1588_s1 + $0x40] ss:$16 sps:$4 sm:$0xff]   ;;  %v1089_v12 = vld [vmem:[%s1588_s1 + $0x48] ss:$16 sps:$4 sm:$0xff]  }
   0x5   :  { %v1090_v13 = vld [vmem:[%s1588_s1 + $0x64] ss:$16 sps:$4 sm:$0xff]   ;;  %v1092_v14 = vld [vmem:[%s1588_s1 + $0x6c] ss:$16 sps:$4 sm:$0xff]   ;;  %v1094_v15 = vld [vmem:[%s1588_s1 + $0x60] ss:$16 sps:$4 sm:$0xff]  }
   0x6   :  { %v1095_v16 = vld [vmem:[%s1588_s1 + $0x68] ss:$16 sps:$4 sm:$0xff]   ;;  %v1096_v17 = vld [vmem:[%s1588_s1 + $0x84] ss:$16 sps:$4 sm:$0xff]   ;;  %v1098_v18 = vld [vmem:[%s1588_s1 + $0x8c] ss:$16 sps:$4 sm:$0xff]  }
   0x7   :  { %242 = vmatpush1.bf16.msra.mxu0 %v1082_v7  ;;  %283 = vmatpush1.bf16.msra.mxu1 %v1083_v8  ;;  %v1100_v19 = vld [vmem:[%s1588_s1 + $0x80] ss:$16 sps:$4 sm:$0xff]   ;;  %v1101_v20 = vld [vmem:[%s1588_s1 + $0x88] ss:$16 sps:$4 sm:$0xff]   ;;  %v1102_v21 = vld [vmem:[%s1588_s1 + $0xa4] ss:$16 sps:$4 sm:$0xff]  }
   0x8   :  { %243 = vmatprep.subr.bf16.mxu0 %v1084_v9  ;;  %284 = vmatprep.subr.bf16.mxu1 %v1086_v10  ;;  %v1104_v22 = vld [vmem:[%s1588_s1 + $0xac] ss:$16 sps:$4 sm:$0xff]   ;;  %v1106_v23 = vld [vmem:[%s1588_s1 + $0xa0] ss:$16 sps:$4 sm:$0xff]   ;;  %v1107_v24 = vld [vmem:[%s1588_s1 + $0xa8] ss:$16 sps:$4 sm:$0xff]  }
   0x9   :  { %v1108_v25 = vld [vmem:[%s1588_s1 + $0xc4] ss:$16 sps:$4 sm:$0xff]   ;;  %v1110_v26 = vld [vmem:[%s1588_s1 + $0xcc] ss:$16 sps:$4 sm:$0xff]   ;;  %v1112_v27 = vld [vmem:[%s1588_s1 + $0xc0] ss:$16 sps:$4 sm:$0xff]  }
   0xa   :  { %v1113_v28 = vld [vmem:[%s1588_s1 + $0xc8] ss:$16 sps:$4 sm:$0xff]   ;;  %v1114_v29 = vld [vmem:[%s1588_s1 + $0xe4] ss:$16 sps:$4 sm:$0xff]   ;;  %v1116_v30 = vld [vmem:[%s1588_s1 + $0xec] ss:$16 sps:$4 sm:$0xff]  }
   0xb   :  { %244 = vmatpush1.bf16.msra.mxu0 %v1088_v11  ;;  %285 = vmatpush1.bf16.msra.mxu1 %v1089_v12  ;;  %v1118_v31 = vld [vmem:[%s1588_s1 + $0xe0] ss:$16 sps:$4 sm:$0xff]   ;;  %v1119_v32 = vld [vmem:[%s1588_s1 + $0xe8] ss:$16 sps:$4 sm:$0xff]   ;;  %v1122_v33 = vld [vmem:[%s1589_s3 + $0x4] ss:$8 sps:$4 sm:$0xff]  }
   0xc   :  { %245 = vmatprep.subr.bf16.mxu0 %v1090_v13  ;;  %286 = vmatprep.subr.bf16.mxu1 %v1092_v14  ;;  %v1125_v34 = vld [vmem:[%s1589_s3 + $0x104] ss:$8 sps:$4 sm:$0xff]   ;;  %v24_v35 = vld [vmem:[%s1590_s0] sm:$0x1]  ;;  %v1128_v38 = vld [vmem:[%s1589_s3 + $0x14] ss:$8 sps:$4 sm:$0xff]  }
   0xd   :  { %v1120_v36 = vld [vmem:[%s1589_s3] ss:$8 sps:$4 sm:$0xff]   ;;  %v1131_v39 = vld [vmem:[%s1589_s3 + $0x114] ss:$8 sps:$4 sm:$0xff]   ;;  %v1126_v40 = vld [vmem:[%s1589_s3 + $0x10] ss:$8 sps:$4 sm:$0xff]  }
   0xe   :  { %v1123_v37 = vld [vmem:[%s1589_s3 + $0x100] ss:$8 sps:$4 sm:$0xff]   ;;  %v1129_v41 = vld [vmem:[%s1589_s3 + $0x110] ss:$8 sps:$4 sm:$0xff]   ;;  %v1134_v42 = vld [vmem:[%s1589_s3 + $0x24] ss:$8 sps:$4 sm:$0xff]  }
   0xf   :  { %246 = vmatpush1.bf16.msra.mxu0 %v1094_v15  ;;  %287 = vmatpush1.bf16.msra.mxu1 %v1095_v16  ;;  %v1137_v43 = vld [vmem:[%s1589_s3 + $0x124] ss:$8 sps:$4 sm:$0xff]   ;;  %v1132_v44 = vld [vmem:[%s1589_s3 + $0x20] ss:$8 sps:$4 sm:$0xff]   ;;  %v1140_v46 = vld [vmem:[%s1589_s3 + $0x34] ss:$8 sps:$4 sm:$0xff]  }
  0x10   :  { %247 = vmatprep.subr.bf16.mxu0 %v1096_v17  ;;  %288 = vmatprep.subr.bf16.mxu1 %v1098_v18  ;;  %v1135_v45 = vld [vmem:[%s1589_s3 + $0x120] ss:$8 sps:$4 sm:$0xff]   ;;  %v1143_v47 = vld [vmem:[%s1589_s3 + $0x134] ss:$8 sps:$4 sm:$0xff]   ;;  %v1138_v48 = vld [vmem:[%s1589_s3 + $0x30] ss:$8 sps:$4 sm:$0xff]  }
  0x11   :  { %v1141_v49 = vld [vmem:[%s1589_s3 + $0x130] ss:$8 sps:$4 sm:$0xff]   ;;  %v1146_v50 = vld [vmem:[%s1589_s3 + $0x44] ss:$8 sps:$4 sm:$0xff]   ;;  %v1144_v52 = vld [vmem:[%s1589_s3 + $0x40] ss:$8 sps:$4 sm:$0xff]  }
  0x12   :  { %v1149_v51 = vld [vmem:[%s1589_s3 + $0x144] ss:$8 sps:$4 sm:$0xff]   ;;  %v1147_v53 = vld [vmem:[%s1589_s3 + $0x140] ss:$8 sps:$4 sm:$0xff]   ;;  %v1152_v54 = vld [vmem:[%s1589_s3 + $0x54] ss:$8 sps:$4 sm:$0xff]  }
  0x13   :  { %248 = vmatpush1.bf16.msra.mxu0 %v1100_v19  ;;  %289 = vmatpush1.bf16.msra.mxu1 %v1101_v20  ;;  %v1155_v55 = vld [vmem:[%s1589_s3 + $0x154] ss:$8 sps:$4 sm:$0xff]   ;;  %v1150_v56 = vld [vmem:[%s1589_s3 + $0x50] ss:$8 sps:$4 sm:$0xff]   ;;  %v1158_v58 = vld [vmem:[%s1589_s3 + $0x64] ss:$8 sps:$4 sm:$0xff]  }
  0x14   :  { %249 = vmatprep.subr.bf16.mxu0 %v1102_v21  ;;  %290 = vmatprep.subr.bf16.mxu1 %v1104_v22  ;;  %v1153_v57 = vld [vmem:[%s1589_s3 + $0x150] ss:$8 sps:$4 sm:$0xff]   ;;  %v1161_v59 = vld [vmem:[%s1589_s3 + $0x164] ss:$8 sps:$4 sm:$0xff]   ;;  %v1156_v60 = vld [vmem:[%s1589_s3 + $0x60] ss:$8 sps:$4 sm:$0xff]  }
  0x15   :  { %v1159_v61 = vld [vmem:[%s1589_s3 + $0x160] ss:$8 sps:$4 sm:$0xff]   ;;  %v1164_v62 = vld [vmem:[%s1589_s3 + $0x74] ss:$8 sps:$4 sm:$0xff]   ;;  %v1162_v0 = vld [vmem:[%s1589_s3 + $0x70] ss:$8 sps:$4 sm:$0xff]  }
  0x16   :  { %v1167_v63 = vld [vmem:[%s1589_s3 + $0x174] ss:$8 sps:$4 sm:$0xff]   ;;  %v1165_v1 = vld [vmem:[%s1589_s3 + $0x170] ss:$8 sps:$4 sm:$0xff]   ;;  %v1170_v2 = vld [vmem:[%s1589_s3 + $0x84] ss:$8 sps:$4 sm:$0xff]  }
  0x17   :  { %250 = vmatpush1.bf16.msra.mxu0 %v1106_v23  ;;  %291 = vmatpush1.bf16.msra.mxu1 %v1107_v24  ;;  %v1173_v3 = vld [vmem:[%s1589_s3 + $0x184] ss:$8 sps:$4 sm:$0xff]   ;;  %v1168_v4 = vld [vmem:[%s1589_s3 + $0x80] ss:$8 sps:$4 sm:$0xff]   ;;  %v1176_v6 = vld [vmem:[%s1589_s3 + $0x94] ss:$8 sps:$4 sm:$0xff]  }
  0x18   :  { %251 = vmatprep.subr.bf16.mxu0 %v1108_v25  ;;  %292 = vmatprep.subr.bf16.mxu1 %v1110_v26  ;;  %v1171_v5 = vld [vmem:[%s1589_s3 + $0x180] ss:$8 sps:$4 sm:$0xff]   ;;  %v1179_v7 = vld [vmem:[%s1589_s3 + $0x194] ss:$8 sps:$4 sm:$0xff]   ;;  %v1174_v8 = vld [vmem:[%s1589_s3 + $0x90] ss:$8 sps:$4 sm:$0xff]  }
  0x19   :  { %v1177_v9 = vld [vmem:[%s1589_s3 + $0x190] ss:$8 sps:$4 sm:$0xff]   ;;  %v1182_v10 = vld [vmem:[%s1589_s3 + $0xa4] ss:$8 sps:$4 sm:$0xff]   ;;  %v1180_v12 = vld [vmem:[%s1589_s3 + $0xa0] ss:$8 sps:$4 sm:$0xff]  }
  0x1a   :  { %v1185_v11 = vld [vmem:[%s1589_s3 + $0x1a4] ss:$8 sps:$4 sm:$0xff]   ;;  %v1183_v13 = vld [vmem:[%s1589_s3 + $0x1a0] ss:$8 sps:$4 sm:$0xff]   ;;  %v1188_v14 = vld [vmem:[%s1589_s3 + $0xb4] ss:$8 sps:$4 sm:$0xff]  }
  0x1b   :  { %252 = vmatpush1.bf16.msra.mxu0 %v1112_v27  ;;  %293 = vmatpush1.bf16.msra.mxu1 %v1113_v28  ;;  %v1191_v15 = vld [vmem:[%s1589_s3 + $0x1b4] ss:$8 sps:$4 sm:$0xff]   ;;  %v1186_v16 = vld [vmem:[%s1589_s3 + $0xb0] ss:$8 sps:$4 sm:$0xff]   ;;  %v1194_v18 = vld [vmem:[%s1589_s3 + $0xc4] ss:$8 sps:$4 sm:$0xff]  }
  0x1c   :  { %253 = vmatprep.subr.bf16.mxu0 %v1114_v29  ;;  %294 = vmatprep.subr.bf16.mxu1 %v1116_v30  ;;  %v1189_v17 = vld [vmem:[%s1589_s3 + $0x1b0] ss:$8 sps:$4 sm:$0xff]   ;;  %v1197_v19 = vld [vmem:[%s1589_s3 + $0x1c4] ss:$8 sps:$4 sm:$0xff]   ;;  %v1192_v20 = vld [vmem:[%s1589_s3 + $0xc0] ss:$8 sps:$4 sm:$0xff]  }
  0x1d   :  { %v1195_v21 = vld [vmem:[%s1589_s3 + $0x1c0] ss:$8 sps:$4 sm:$0xff]   ;;  %v1200_v22 = vld [vmem:[%s1589_s3 + $0xd4] ss:$8 sps:$4 sm:$0xff]   ;;  %v1198_v24 = vld [vmem:[%s1589_s3 + $0xd0] ss:$8 sps:$4 sm:$0xff]  }
  0x1e   :  { %v1203_v23 = vld [vmem:[%s1589_s3 + $0x1d4] ss:$8 sps:$4 sm:$0xff]   ;;  %v1201_v25 = vld [vmem:[%s1589_s3 + $0x1d0] ss:$8 sps:$4 sm:$0xff]   ;;  %v1206_v26 = vld [vmem:[%s1589_s3 + $0xe4] ss:$8 sps:$4 sm:$0xff]  }
  0x1f   :  { %254 = vmatpush1.bf16.msra.mxu0 %v1118_v31  ;;  %295 = vmatpush1.bf16.msra.mxu1 %v1119_v32  ;;  %v1209_v27 = vld [vmem:[%s1589_s3 + $0x1e4] ss:$8 sps:$4 sm:$0xff]   ;;  %v1204_v28 = vld [vmem:[%s1589_s3 + $0xe0] ss:$8 sps:$4 sm:$0xff]   ;;  %v1210_v30 = vld [vmem:[%s1589_s3 + $0xf0] ss:$8 sps:$4 sm:$0xff]  }
  0x20   :  { %814 = vmatprep.subr.bf16.mxu1 %v1122_v33  ;;  %855 = vmatprep.subr.bf16.mxu0 %v1125_v34  ;;  %v1207_v29 = vld [vmem:[%s1589_s3 + $0x1e0] ss:$8 sps:$4 sm:$0xff]   ;;  %v1212_v31 = vld [vmem:[%s1589_s3 + $0xf4] ss:$8 sps:$4 sm:$0xff]   ;;  %v1213_v32 = vld [vmem:[%s1589_s3 + $0x1f0] ss:$8 sps:$4 sm:$0xff]   ;;  %v59_v34 = vlaneseq }
  0x21   :  { %v1215_v33 = vld [vmem:[%s1589_s3 + $0x1f4] ss:$8 sps:$4 sm:$0xff]  }
  0x22   :  { %272 = vmatmul.mubr.bf16.vlgmr.msra.gmra.mrb[0].mxu0 %v24_v35  ;;  %313 = vmatmul.mubr.bf16.vlgmr.msra.gmra.mrb[0].mxu1 %v24_v35  ;;  %v60_v35 = vshrl.u32 %v59_v34, 7 }
  0x23   :  { %815 = vmatpush1.bf16.msra.mxu1 %v1120_v36  ;;  %856 = vmatpush1.bf16.msra.mxu0 %v1123_v37 }
  0x24   :  { %816 = vmatprep.subr.bf16.mxu1 %v1128_v38  ;;  %857 = vmatprep.subr.bf16.mxu0 %v1131_v39  ;;  %v1555_v36 = vsub.s32 0, %v60_v35  ;;  %v69_v37 = vsub.s32 2, %v60_v35  ;;  %v57_v38 = vld [vmem:[%s1591_s2] sm:$0xf]  ;;  %v1560_v39 = vsub.s32 1, %v60_v35 }
  0x27   :  { %817 = vmatpush1.bf16.msra.mxu1 %v1126_v40  ;;  %858 = vmatpush1.bf16.msra.mxu0 %v1129_v41  ;;  %v73_v40 = vsub.s32 3, %v60_v35  ;;  %v62_v41 = vrot.slane %v57_v38, %v1555_v36 }
  0x28   :  { %818 = vmatprep.subr.bf16.mxu1 %v1134_v42  ;;  %859 = vmatprep.subr.bf16.mxu0 %v1137_v43  ;;  %v70_v42 = vrot.slane %v57_v38, %v69_v37  ;;  %v66_v43 = vrot.slane %v57_v38, %v1560_v39 }
  0x2b   :  { %819 = vmatpush1.bf16.msra.mxu1 %v1132_v44  ;;  %860 = vmatpush1.bf16.msra.mxu0 %v1135_v45  ;;  %v74_v44 = vrot.slane %v57_v38, %v73_v40  ;;  %v940_v40 = vld [vmem:[%s1593_s5] sm:$0x3] }
  0x2c   :  { %820 = vmatprep.subr.bf16.mxu1 %v1140_v46  ;;  %861 = vmatprep.subr.bf16.mxu0 %v1143_v47  ;;  %v1564_v46 = vand.u32 127, %v59_v34 }
  0x2e   :  { %v900_v37 = vand.u32 31, %v1564_v46 }
  0x2f   :  { %821 = vmatpush1.bf16.msra.mxu1 %v1138_v48  ;;  %862 = vmatpush1.bf16.msra.mxu0 %v1141_v49 }
  0x30   :  { %822 = vmatprep.subr.bf16.mxu1 %v1146_v50  ;;  %863 = vmatprep.subr.bf16.mxu0 %v1149_v51  ;;  %vm922_vm8 = vcmp.lt.s32.totalorder %v900_v37, 16  ;;  %vm930_vm9 = vcmp.ge.s32.totalorder %v900_v37, 16 }
  0x33   :  { %823 = vmatpush1.bf16.msra.mxu1 %v1144_v52  ;;  %864 = vmatpush1.bf16.msra.mxu0 %v1147_v53 }
  0x34   :  { %824 = vmatprep.subr.bf16.mxu1 %v1152_v54  ;;  %865 = vmatprep.subr.bf16.mxu0 %v1155_v55 }
  0x37   :  { %825 = vmatpush1.bf16.msra.mxu1 %v1150_v56  ;;  %866 = vmatpush1.bf16.msra.mxu0 %v1153_v57 }
  0x38   :  { %826 = vmatprep.subr.bf16.mxu1 %v1158_v58  ;;  %867 = vmatprep.subr.bf16.mxu0 %v1161_v59  ;;  %v324_v58 = vadd.s32 256, %v1564_v46  ;;  %v1568_v59 = vadd.s32 128, %v1564_v46 }
  0x3a   :  { %v907_v38 = vand.u32 31, %v1568_v59 }
  0x3b   :  { %827 = vmatpush1.bf16.msra.mxu1 %v1156_v60  ;;  %868 = vmatpush1.bf16.msra.mxu0 %v1159_v61  ;;  %v325_v60 = vadd.s32 384, %v1564_v46  ;;  %v330_v61 = vand.u32 63, %v1564_v46 }
  0x3c   :  { %828 = vmatprep.subr.bf16.mxu1 %v1164_v62  ;;  %869 = vmatprep.subr.bf16.mxu0 %v1167_v63  ;;  %v344_v62 = vand.u32 63, %v324_v58  ;;  %v337_v63 = vand.u32 63, %v1568_v59  ;;  %vm923_vm10 = vcmp.lt.s32.totalorder %v907_v38, 16  ;;  %vm931_vm11 = vcmp.ge.s32.totalorder %v907_v38, 16 }
  0x3d   :  { %vm378_vm0 = vcmp.lt.s32.totalorder %v330_v61, 32  ;;  %vm394_vm1 = vcmp.ge.s32.totalorder %v330_v61, 32 }
  0x3e   :  { %vm380_vm2 = vcmp.lt.s32.totalorder %v344_v62, 32  ;;  %vm379_vm3 = vcmp.lt.s32.totalorder %v337_v63, 32  ;;  %vm396_vm4 = vcmp.ge.s32.totalorder %v344_v62, 32  ;;  %vm395_vm6 = vcmp.ge.s32.totalorder %v337_v63, 32 }
  0x3f   :  { %829 = vmatpush1.bf16.msra.mxu1 %v1162_v0  ;;  %870 = vmatpush1.bf16.msra.mxu0 %v1165_v1  ;;  %v351_v0 = vand.u32 63, %v325_v60 }
  0x40   :  { %830 = vmatprep.subr.bf16.mxu1 %v1170_v2  ;;  %871 = vmatprep.subr.bf16.mxu0 %v1173_v3 }
  0x41   :  { %vm381_vm5 = vcmp.lt.s32.totalorder %v351_v0, 32  ;;  %vm397_vm7 = vcmp.ge.s32.totalorder %v351_v0, 32 }
  0x43   :  { %831 = vmatpush1.bf16.msra.mxu1 %v1168_v4  ;;  %872 = vmatpush1.bf16.msra.mxu0 %v1171_v5 }
  0x44   :  { %832 = vmatprep.subr.bf16.mxu1 %v1176_v6  ;;  %873 = vmatprep.subr.bf16.mxu0 %v1179_v7 }
  0x47   :  { %833 = vmatpush1.bf16.msra.mxu1 %v1174_v8  ;;  %874 = vmatpush1.bf16.msra.mxu0 %v1177_v9 }
  0x48   :  { %834 = vmatprep.subr.bf16.mxu1 %v1182_v10  ;;  %875 = vmatprep.subr.bf16.mxu0 %v1185_v11 }
  0x4b   :  { %835 = vmatpush1.bf16.msra.mxu1 %v1180_v12  ;;  %876 = vmatpush1.bf16.msra.mxu0 %v1183_v13 }
  0x4c   :  { %836 = vmatprep.subr.bf16.mxu1 %v1188_v14  ;;  %877 = vmatprep.subr.bf16.mxu0 %v1191_v15 }
  0x4f   :  { %837 = vmatpush1.bf16.msra.mxu1 %v1186_v16  ;;  %878 = vmatpush1.bf16.msra.mxu0 %v1189_v17 }
  0x50   :  { %838 = vmatprep.subr.bf16.mxu1 %v1194_v18  ;;  %879 = vmatprep.subr.bf16.mxu0 %v1197_v19 }
  0x53   :  { %839 = vmatpush1.bf16.msra.mxu1 %v1192_v20  ;;  %880 = vmatpush1.bf16.msra.mxu0 %v1195_v21  ;;  %v478_v21 = vld [vmem:[%s1592_s4] sm:$0x3] }
  0x54   :  { %840 = vmatprep.subr.bf16.mxu1 %v1200_v22  ;;  %881 = vmatprep.subr.bf16.mxu0 %v1203_v23  ;;  %v487_v22 = vrot.slane %v478_v21, %v1555_v36  ;;  %v491_v23 = vrot.slane %v478_v21, %v1560_v39 }
  0x57   :  { %841 = vmatpush1.bf16.msra.mxu1 %v1198_v24  ;;  %882 = vmatpush1.bf16.msra.mxu0 %v1201_v25 }
  0x58   :  { %842 = vmatprep.subr.bf16.mxu1 %v1206_v26  ;;  %883 = vmatprep.subr.bf16.mxu0 %v1209_v27 }
  0x5b   :  { %843 = vmatpush1.bf16.msra.mxu1 %v1204_v28  ;;  %884 = vmatpush1.bf16.msra.mxu0 %v1207_v29 }
  0x5c   :  { %844 = vmatprep.subr.bf16.mxu1 %v1212_v31  ;;  %885 = vmatprep.subr.bf16.mxu0 %v1215_v33 }
  0x5f   :  { %845 = vmatpush1.bf16.msra.mxu1 %v1210_v30  ;;  %886 = vmatpush1.bf16.msra.mxu0 %v1213_v32 }
  0xf5   :  { %v273_v45 = vpop.f32.mrb[0].mxu0  ;;  %v314_v47 = vpop.f32.mrb[0].mxu1 }
  0xf6   :  { %v274_v48 = vadd.f32 %v273_v45, %v62_v41  ;;  %v315_v49 = vadd.f32 %v314_v47, %v70_v42  ;;  %v275_v50 = vpop.f32.mrb[1].mxu0  ;;  %v316_v51 = vpop.f32.mrb[1].mxu1 }
  0xf7   :  { %v276_v52 = vadd.f32 %v275_v50, %v66_v43  ;;  %v317_v53 = vadd.f32 %v316_v51, %v74_v44  ;;  %v277_v54 = vpop.f32.mrb[2].mxu0  ;;  %v318_v55 = vpop.f32.mrb[2].mxu1  ;;  %v945_v43 = vrot.slane %v940_v40, %v1555_v36  ;;  %v949_v44 = vrot.slane %v940_v40, %v1560_v39 }
  0xf8   :  { %1216 = vtanh.f32 %v274_v48  ;;  %v278_v56 = vpop.f32.mrb[3].mxu0  ;;  %v319_v57 = vpop.f32.mrb[3].mxu1  ;;  %v386_v1 = vmax.f32 %v274_v48, 0.0  ;;  %v388_v2 = vmax.f32 %v315_v49, 0.0 }
  0xf9   :  { %1218 = vtanh.f32 %v315_v49  ;;  %v387_v3 = vmax.f32 %v276_v52, 0.0  ;;  %v389_v4 = vmax.f32 %v317_v53, 0.0 }
  0xfa   :  { %1220 = vtanh.f32 %v276_v52  ;;  %v390_v7 = vsel %vm378_vm0, %v386_v1, %v274_v48  ;;  %v392_v10 = vsel %vm380_vm2, %v388_v2, %v315_v49 }
  0xfb   :  { %1222 = vtanh.f32 %v317_v53  ;;  %v391_v11 = vsel %vm379_vm3, %v387_v3, %v276_v52  ;;  %v393_v14 = vsel %vm381_vm5, %v389_v4, %v317_v53 }
 0x102   :  { %v1217_v5 = vpop.eup %1216 }
 0x103   :  { %v1219_v6 = vpop.eup %1218  ;;  %v410_v9 = vsel %vm394_vm1, %v1217_v5, %v390_v7 }
 0x104   :  { %v1221_v8 = vpop.eup %1220  ;;  %v412_v13 = vsel %vm396_vm4, %v1219_v6, %v392_v10  ;;  %v479_v19 = vpack.c.bf16 %v410_v9, %v410_v9 }
 0x105   :  { %v1223_v12 = vpop.eup %1222  ;;  %v411_v15 = vsel %vm395_vm6, %v1221_v8, %v391_v11  ;;  %v481_v20 = vpack.c.bf16 %v412_v13, %v412_v13 }
 0x106   :  { %v480_v16 = vpack.c.bf16 %v411_v15, %v411_v15  ;;  %v413_v17 = vsel %vm397_vm7, %v1223_v12, %v393_v14 }
 0x107   :  { %v482_v18 = vpack.c.bf16 %v413_v17, %v413_v17 }
 0x108   :  { %846 = vmatprep.mubr.bf16.mxu1 %v480_v16 }
 0x109   :  { %887 = vmatprep.mubr.bf16.mxu0 %v482_v18  ;;  %847 = vmatmul.mubr.bf16.vlgmr.msra.gmra.mrb[4].mxu1 %v479_v19 }
 0x10a   :  { %888 = vmatmul.mubr.bf16.vlgmr.msra.gmra.mrb[4].mxu0 %v481_v20 }
 0x1dc   :  { %v848_v24 = vpop.f32.mrb[4].mxu1 }
 0x1dd   :  { %v849_v25 = vadd.f32 %v848_v24, %v487_v22  ;;  %v889_v26 = vpop.f32.mrb[4].mxu0  ;;  %v850_v27 = vpop.f32.mrb[5].mxu1 }
 0x1de   :  { %v851_v28 = vadd.f32 %v850_v27, %v491_v23  ;;  %v891_v29 = vpop.f32.mrb[5].mxu0  ;;  %v852_v30 = vpop.f32.mrb[6].mxu1 }
 0x1df   :  { %v890_v31 = vadd.f32 %v889_v26, %v849_v25  ;;  %v893_v32 = vpop.f32.mrb[6].mxu0  ;;  %v853_v33 = vpop.f32.mrb[7].mxu1 }
 0x1e0   :  { %v892_v34 = vadd.f32 %v891_v29, %v851_v28  ;;  %v894_v35 = vpop.f32.mrb[7].mxu0 }
 0x1e1   :  { %1224 = vtanh.f32 %v890_v31  ;;  %v926_v41 = vmax.f32 %v890_v31, 0.0 }
 0x1e2   :  { %1226 = vtanh.f32 %v892_v34  ;;  %v927_v42 = vmax.f32 %v892_v34, 0.0 }
 0x1e3   :  { %v928_v47 = vsel %vm922_vm8, %v926_v41, %v890_v31 }
 0x1e4   :  { %v929_v49 = vsel %vm923_vm10, %v927_v42, %v892_v34 }
 0x1eb   :  { %v1225_v45 = vpop.eup %1224 }
 0x1ec   :  { %v1227_v48 = vpop.eup %1226  ;;  %v938_v46 = vsel %vm930_vm9, %v1225_v45, %v928_v47 }
 0x1ed   :  { %v952_v50 = vadd.f32 %v945_v43, %v938_v46  ;;  %v939_v51 = vsel %vm931_vm11, %v1227_v48, %v929_v49 }
 0x1ee   :  { %v953_v52 = vadd.f32 %v949_v44, %v939_v51 }
 0x1f0   :  { %v956_v53 = vcombine.low %v952_v50, %v953_v52 }
 0x1f2   :  { %1066 = vst.sshfl [vmem:[%s1594_s6] sm:$0x33 pattern:$0x76325410] %v956_v53 }

</bundles_post_ra>
